<compile_context>
chip_gen: v7x
topology: tpu7x:2x2x1
jax: 0.10.0
libtpu: 0.0.40
codegen_flags: <defaults>
</compile_context>

<pallas_src>
import functools
import math

import jax
import jax.numpy as jnp
from jax.experimental import pallas as pl
from jax.experimental.pallas import tpu as pltpu

EPS = 1e-5


# ----------------------- fused GN + QKV + attention + out -------------------
def _fused_attn_kernel(x_ref, wqkv_ref, bqkv_ref, wo_ref, bo_ref,
                       out_ref, attn_out_ref, *,
                       num_heads, num_groups, hid, add_residual):
    x = x_ref[0]                                              # (C, N) f32
    C, N = x.shape
    cg = C // num_groups
    inv_cnt = 1.0 / float(cg * N)

    # ---- GroupNorm (no affine here: gamma/beta folded into W_qkv) ----------
    # Lane-axis reduce first (XLU), then a tiny per-group sublane combine;
    # avoids reshaping the big (C, N) tile.
    s1 = jnp.sum(x, axis=1, keepdims=True)                    # (C, 1)
    mean_g = jnp.sum(s1.reshape(num_groups, cg), axis=1, keepdims=True) * inv_cnt
    mean_c = jnp.broadcast_to(mean_g, (num_groups, cg)).reshape(C, 1)
    xc = x - mean_c
    s2 = jnp.sum(xc * xc, axis=1, keepdims=True)              # (C, 1)
    var_g = jnp.sum(s2.reshape(num_groups, cg), axis=1, keepdims=True) * inv_cnt
    inv_g = jax.lax.rsqrt(var_g + EPS)
    inv_c = jnp.broadcast_to(inv_g, (num_groups, cg)).reshape(C, 1)
    x_hat = xc * inv_c                                        # (C, N)

    # ---- Fused QKV projection: ONE matmul (GN affine + scale pre-folded) ---
    qkv = jnp.dot(wqkv_ref[...], x_hat,
                  preferred_element_type=jnp.float32) + bqkv_ref[...]  # (3*hid, N)

    d = hid // num_heads
    head_outs = []
    for h in range(num_heads):          # static unroll — num_heads is small
        q = qkv[h * d:(h + 1) * d, :]                         # (d, N), already *scale
        k = qkv[hid + h * d: hid + (h + 1) * d, :]            # (d, N), already *scale
        v = qkv[2 * hid + h * d: 2 * hid + (h + 1) * d, :]    # (d, N)
        # logits[i, j] = sum_d q[d, i] * k[d, j]
        logits = jax.lax.dot_general(q, k, (((0,), (0,)), ((), ())),
                                     preferred_element_type=jnp.float32)  # (N, N)
        m = jnp.max(logits, axis=-1, keepdims=True)
        e = jnp.exp(logits - m)
        attn = e * pl.reciprocal(jnp.sum(e, axis=-1, keepdims=True), approx=True)
        # out[d, i] = sum_j v[d, j] * attn[i, j]
        head_outs.append(
            jax.lax.dot_general(v, attn, (((1,), (1,)), ((), ())),
                                preferred_element_type=jnp.float32))      # (d, N)

    attn_out = head_outs[0] if num_heads == 1 else jnp.concatenate(head_outs, axis=0)
    attn_out_ref[0] = attn_out                                # (hid, N)

    # ---- Output projection + residual (fused; no extra HBM round trip) -----
    proj = jnp.dot(wo_ref[...], attn_out,
                   preferred_element_type=jnp.float32) + bo_ref[...]      # (Cout, N)
    if add_residual:
        proj = proj + x
    out_ref[0] = proj


def attention_forward(x, params, *, num_heads, ch_per_head, num_groups):
    B, C = x.shape[:2]
    spatial = x.shape[2:]
    N = math.prod(spatial)
    hid = num_heads * ch_per_head
    scale = float(ch_per_head) ** (-0.25)

    gamma = params["gn_gamma"].reshape(C)
    beta = params["gn_beta"].reshape(C)

    def fold(w, b, s):
        # GN affine + attention scale folded into the 1x1-conv weights:
        #   W' = s * W * diag(gamma),  b' = s * (b + W @ beta)
        return (w * gamma[None, :]) * s, (b + w @ beta) * s

    wq, bq = fold(params["wq"], params["bq"], scale)
    wk, bk = fold(params["wk"], params["bk"], scale)
    wv, bv = fold(params["wv"], params["bv"], 1.0)
    wqkv = jnp.concatenate([wq, wk, wv], axis=0)                  # (3*hid, C)
    bqkv = jnp.concatenate([bq, bk, bv], axis=0).reshape(3 * hid, 1)

    wo = params["wo"]                                             # (Cout, hid)
    bo = params["bo"].reshape(-1, 1)                              # (Cout, 1)
    Cout = wo.shape[0]
    add_residual = (Cout == C)

    x3 = x.reshape(B, C, N).astype(jnp.float32)

    out, attn_out = pl.pallas_call(
        functools.partial(_fused_attn_kernel, num_heads=num_heads,
                          num_groups=num_groups, hid=hid,
                          add_residual=add_residual),
        out_shape=(jax.ShapeDtypeStruct((B, Cout, N), jnp.float32),
                   jax.ShapeDtypeStruct((B, hid, N), jnp.float32)),
        grid=(B,),
        in_specs=[
            pl.BlockSpec((1, C, N), lambda b: (b, 0, 0)),
            pl.BlockSpec((3 * hid, C), lambda b: (0, 0)),
            pl.BlockSpec((3 * hid, 1), lambda b: (0, 0)),
            pl.BlockSpec((Cout, hid), lambda b: (0, 0)),
            pl.BlockSpec((Cout, 1), lambda b: (0, 0)),
        ],
        out_specs=(pl.BlockSpec((1, Cout, N), lambda b: (b, 0, 0)),
                   pl.BlockSpec((1, hid, N), lambda b: (b, 0, 0))),
        compiler_params=pltpu.CompilerParams(
            dimension_semantics=("parallel",)),
    )(x3, wqkv, bqkv, wo, bo)

    out = out.reshape(B, Cout, *spatial)
    return out, attn_out


# ------------------------------- pure-JAX ref --------------------------------
def reference_forward(x, params, *, num_heads, ch_per_head, num_groups):
    B, C = x.shape[:2]
    spatial = x.shape[2:]
    N = math.prod(spatial)
    scale = float(ch_per_head) ** (-0.25)
    x3 = x.reshape(B, C, N)

    g = x3.reshape(B, num_groups, (C // num_groups) * N)
    mean = jnp.mean(g, axis=2, keepdims=True)
    var = jnp.mean((g - mean) ** 2, axis=2, keepdims=True)
    xn = ((g - mean) * jax.lax.rsqrt(var + EPS)).reshape(B, C, N)
    xn = xn * params["gn_gamma"].reshape(1, C, 1) + params["gn_beta"].reshape(1, C, 1)

    def proj(w, b):
        return jnp.einsum("oc,bcn->bon", w, xn,
                          precision=jax.lax.Precision.HIGHEST) + b[None, :, None]

    q = proj(params["wq"], params["bq"])
    k = proj(params["wk"], params["bk"])
    v = proj(params["wv"], params["bv"])
    hid = q.shape[1]
    d = hid // num_heads
    qh = q.reshape(B * num_heads, d, N)
    kh = k.reshape(B * num_heads, d, N)
    vh = v.reshape(B * num_heads, d, N)
    logits = jnp.einsum("bdi,bdj->bij", qh * scale, kh * scale,
                        precision=jax.lax.Precision.HIGHEST)
    attn = jax.nn.softmax(logits, axis=-1)
    oh = jnp.einsum("bij,bdj->bdi", attn, vh,
                    precision=jax.lax.Precision.HIGHEST)
    attn_out = oh.reshape(B, hid, N)
    out = jnp.einsum("oc,bcn->bon", params["wo"], attn_out,
                     precision=jax.lax.Precision.HIGHEST) + params["bo"].reshape(1, -1, 1)
    out = out.reshape(B, out.shape[1], *spatial)
    if out.shape == x.shape:
        out = x + out
    return out, attn_out


# ---------------------------------- main --------------------------------------
if __name__ == "__main__":
    # Module config (small): spatial_dims=2, in_channels=out_channels=32,
    # num_heads=2, ch_per_head=8, GroupNorm(num_groups=32, affine=True).
    B, C, H, W = 2, 32, 8, 8
    num_heads, ch_per_head = 2, 8
    num_groups = 32
    hid = num_heads * ch_per_head
    out_channels = C

    key = jax.random.PRNGKey(0)
    ks = jax.random.split(key, 11)
    params = {
        "gn_gamma": 1.0 + 0.05 * jax.random.normal(ks[0], (C,), jnp.float32),
        "gn_beta": 0.05 * jax.random.normal(ks[1], (C,), jnp.float32),
        "wq": jax.random.normal(ks[2], (hid, C), jnp.float32) / math.sqrt(C),
        "bq": 0.02 * jax.random.normal(ks[3], (hid,), jnp.float32),
        "wk": jax.random.normal(ks[4], (hid, C), jnp.float32) / math.sqrt(C),
        "bk": 0.02 * jax.random.normal(ks[5], (hid,), jnp.float32),
        "wv": jax.random.normal(ks[6], (hid, C), jnp.float32) / math.sqrt(C),
        "bv": 0.02 * jax.random.normal(ks[7], (hid,), jnp.float32),
        # to_out is zero_module'd at __init__ (weights/bias = 0).  Use non-zero
        # values here so the fused projection + residual path is actually
        # exercised by the numerical check; the zero-init case is checked below.
        "wo": jax.random.normal(ks[8], (out_channels, hid), jnp.float32) / math.sqrt(hid),
        "bo": 0.02 * jax.random.normal(ks[9], (out_channels,), jnp.float32),
    }

    x = jax.random.normal(ks[10], (B, C, H, W), jnp.float32)

    out, attn_out = attention_forward(
        x, params, num_heads=num_heads, ch_per_head=ch_per_head,
        num_groups=num_groups)
    out = jax.block_until_ready(out)
    attn_out = jax.block_until_ready(attn_out)

    ref_out, ref_attn = reference_forward(
        x, params, num_heads=num_heads, ch_per_head=ch_per_head,
        num_groups=num_groups)

    assert out.shape == x.shape, (out.shape, x.shape)
    assert jnp.allclose(attn_out, ref_attn, rtol=2e-2, atol=2e-3), \
        float(jnp.max(jnp.abs(attn_out - ref_attn)))
    assert jnp.allclose(out, ref_out, rtol=2e-2, atol=2e-3), \
        float(jnp.max(jnp.abs(out - ref_out)))

    # zero_module init state: output projection is all-zeros -> out == x.
    params_init = dict(params,
                       wo=jnp.zeros_like(params["wo"]),
                       bo=jnp.zeros_like(params["bo"]))
    out0, _ = attention_forward(
        x, params_init, num_heads=num_heads, ch_per_head=ch_per_head,
        num_groups=num_groups)
    out0 = jax.block_until_ready(out0)
    assert jnp.allclose(out0, x, atol=1e-6), float(jnp.max(jnp.abs(out0 - x)))

    print("KERNEL_OK")
</pallas_src>

<mosaic_0001>
module attributes {stable_mosaic.version = 11 : i64} {
  func.func @_fused_attn_kernel(%arg0: i32, %arg1: memref<1x32x64xf32, #tpu.memory_space<vmem>>, %arg2: memref<48x32xf32, #tpu.memory_space<vmem>>, %arg3: memref<48x1xf32, #tpu.memory_space<vmem>>, %arg4: memref<32x16xf32, #tpu.memory_space<vmem>>, %arg5: memref<32x1xf32, #tpu.memory_space<vmem>>, %arg6: memref<1x32x64xf32, #tpu.memory_space<vmem>>, %arg7: memref<1x16x64xf32, #tpu.memory_space<vmem>>) attributes {dimension_semantics = [#tpu.dimension_semantics<parallel>], iteration_bounds = array<i64: 2>, scalar_prefetch = 0 : i64, scratch_operands = 0 : i64, tpu.core_type = #tpu.core_type<tc>, window_params = [{transform_indices = @transform_0, window_bounds = array<i64: 1, 32, 64>}, {pipeline_mode = #tpu.pipeline_mode<synchronous>, transform_indices = @transform_1, window_bounds = array<i64: 48, 32>}, {pipeline_mode = #tpu.pipeline_mode<synchronous>, transform_indices = @transform_2, window_bounds = array<i64: 48, 1>}, {pipeline_mode = #tpu.pipeline_mode<synchronous>, transform_indices = @transform_3, window_bounds = array<i64: 32, 16>}, {pipeline_mode = #tpu.pipeline_mode<synchronous>, transform_indices = @transform_4, window_bounds = array<i64: 32, 1>}, {transform_indices = @transform_5, window_bounds = array<i64: 1, 32, 64>}, {transform_indices = @transform_6, window_bounds = array<i64: 1, 16, 64>}]} {
    %c0 = arith.constant 0 : index
    %c0_0 = arith.constant 0 : index
    %c0_1 = arith.constant 0 : index
    %0 = vector.load %arg1[%c0, %c0_0, %c0_1] : memref<1x32x64xf32, #tpu.memory_space<vmem>>, vector<1x32x64xf32>
    %1 = vector.shape_cast %0 : vector<1x32x64xf32> to vector<32x64xf32>
    %cst = arith.constant dense<0.000000e+00> : vector<32xf32>
    %2 = vector.multi_reduction <add>, %1, %cst [1] : vector<32x64xf32> to vector<32xf32>
    %3 = vector.shape_cast %2 : vector<32xf32> to vector<32x1xf32>
    %cst_2 = arith.constant dense<0.000000e+00> : vector<32xf32>
    %4 = vector.multi_reduction <add>, %3, %cst_2 [1] : vector<32x1xf32> to vector<32xf32>
    %5 = vector.shape_cast %4 : vector<32xf32> to vector<32x1xf32>
    %cst_3 = arith.constant 1.562500e-02 : f32
    %6 = vector.broadcast %cst_3 : f32 to vector<32x1xf32>
    %7 = arith.mulf %5, %6 : vector<32x1xf32>
    %8 = vector.broadcast %7 : vector<32x1xf32> to vector<32x64xf32>
    %9 = arith.subf %1, %8 : vector<32x64xf32>
    %10 = arith.mulf %9, %9 : vector<32x64xf32>
    %cst_4 = arith.constant dense<0.000000e+00> : vector<32xf32>
    %11 = vector.multi_reduction <add>, %10, %cst_4 [1] : vector<32x64xf32> to vector<32xf32>
    %12 = vector.shape_cast %11 : vector<32xf32> to vector<32x1xf32>
    %cst_5 = arith.constant dense<0.000000e+00> : vector<32xf32>
    %13 = vector.multi_reduction <add>, %12, %cst_5 [1] : vector<32x1xf32> to vector<32xf32>
    %14 = vector.shape_cast %13 : vector<32xf32> to vector<32x1xf32>
    %cst_6 = arith.constant 1.562500e-02 : f32
    %15 = vector.broadcast %cst_6 : f32 to vector<32x1xf32>
    %16 = arith.mulf %14, %15 : vector<32x1xf32>
    %cst_7 = arith.constant 9.99999974E-6 : f32
    %17 = vector.broadcast %cst_7 : f32 to vector<32x1xf32>
    %18 = arith.addf %16, %17 : vector<32x1xf32>
    %19 = math.rsqrt %18 : vector<32x1xf32>
    %20 = vector.broadcast %19 : vector<32x1xf32> to vector<32x64xf32>
    %21 = arith.mulf %9, %20 : vector<32x64xf32>
    %c0_8 = arith.constant 0 : index
    %c0_9 = arith.constant 0 : index
    %22 = vector.load %arg2[%c0_8, %c0_9] : memref<48x32xf32, #tpu.memory_space<vmem>>, vector<48x32xf32>
    %cst_10 = arith.constant dense<0.000000e+00> : vector<48x64xf32>
    %23 = tpu.matmul %22, %21, %cst_10 {dimension_numbers = #tpu.dot_dimension_numbers<[1], [0], [0], [1], [0, 0, 1, 1], [], []>} : vector<48x32xf32>, vector<32x64xf32>, vector<48x64xf32> -> vector<48x64xf32>
    %c0_11 = arith.constant 0 : index
    %c0_12 = arith.constant 0 : index
    %24 = vector.load %arg3[%c0_11, %c0_12] : memref<48x1xf32, #tpu.memory_space<vmem>>, vector<48x1xf32>
    %25 = vector.broadcast %24 : vector<48x1xf32> to vector<48x64xf32>
    %26 = arith.addf %23, %25 : vector<48x64xf32>
    %27 = vector.extract_strided_slice %26 {offsets = [0, 0], sizes = [8, 64], strides = [1, 1]} : vector<48x64xf32> to vector<8x64xf32>
    %28 = vector.extract_strided_slice %26 {offsets = [16, 0], sizes = [8, 64], strides = [1, 1]} : vector<48x64xf32> to vector<8x64xf32>
    %29 = vector.extract_strided_slice %26 {offsets = [32, 0], sizes = [8, 64], strides = [1, 1]} : vector<48x64xf32> to vector<8x64xf32>
    %cst_13 = arith.constant dense<0.000000e+00> : vector<64x64xf32>
    %30 = tpu.matmul %27, %28, %cst_13 {dimension_numbers = #tpu.dot_dimension_numbers<[0], [0], [1], [1], [0, 1, 1, 1], [], []>} : vector<8x64xf32>, vector<8x64xf32>, vector<64x64xf32> -> vector<64x64xf32>
    %cst_14 = arith.constant dense<0xFF800000> : vector<64xf32>
    %31 = vector.multi_reduction <maximumf>, %30, %cst_14 [1] : vector<64x64xf32> to vector<64xf32>
    %32 = vector.shape_cast %31 : vector<64xf32> to vector<64x1xf32>
    %33 = vector.broadcast %32 : vector<64x1xf32> to vector<64x64xf32>
    %34 = arith.subf %30, %33 : vector<64x64xf32>
    %35 = math.exp %34 : vector<64x64xf32>
    %cst_15 = arith.constant dense<0.000000e+00> : vector<64xf32>
    %36 = vector.multi_reduction <add>, %35, %cst_15 [1] : vector<64x64xf32> to vector<64xf32>
    %37 = vector.shape_cast %36 : vector<64xf32> to vector<64x1xf32>
    %38 = tpu.reciprocal %37 {approx = true} : vector<64x1xf32> -> vector<64x1xf32>
    %39 = vector.broadcast %38 : vector<64x1xf32> to vector<64x64xf32>
    %40 = arith.mulf %35, %39 : vector<64x64xf32>
    %cst_16 = arith.constant dense<0.000000e+00> : vector<8x64xf32>
    %41 = tpu.matmul %29, %40, %cst_16 {dimension_numbers = #tpu.dot_dimension_numbers<[1], [1], [0], [0], [0, 0, 1, 0], [], []>} : vector<8x64xf32>, vector<64x64xf32>, vector<8x64xf32> -> vector<8x64xf32>
    %42 = vector.extract_strided_slice %26 {offsets = [8, 0], sizes = [8, 64], strides = [1, 1]} : vector<48x64xf32> to vector<8x64xf32>
    %43 = vector.extract_strided_slice %26 {offsets = [24, 0], sizes = [8, 64], strides = [1, 1]} : vector<48x64xf32> to vector<8x64xf32>
    %44 = vector.extract_strided_slice %26 {offsets = [40, 0], sizes = [8, 64], strides = [1, 1]} : vector<48x64xf32> to vector<8x64xf32>
    %cst_17 = arith.constant dense<0.000000e+00> : vector<64x64xf32>
    %45 = tpu.matmul %42, %43, %cst_17 {dimension_numbers = #tpu.dot_dimension_numbers<[0], [0], [1], [1], [0, 1, 1, 1], [], []>} : vector<8x64xf32>, vector<8x64xf32>, vector<64x64xf32> -> vector<64x64xf32>
    %cst_18 = arith.constant dense<0xFF800000> : vector<64xf32>
    %46 = vector.multi_reduction <maximumf>, %45, %cst_18 [1] : vector<64x64xf32> to vector<64xf32>
    %47 = vector.shape_cast %46 : vector<64xf32> to vector<64x1xf32>
    %48 = vector.broadcast %47 : vector<64x1xf32> to vector<64x64xf32>
    %49 = arith.subf %45, %48 : vector<64x64xf32>
    %50 = math.exp %49 : vector<64x64xf32>
    %cst_19 = arith.constant dense<0.000000e+00> : vector<64xf32>
    %51 = vector.multi_reduction <add>, %50, %cst_19 [1] : vector<64x64xf32> to vector<64xf32>
    %52 = vector.shape_cast %51 : vector<64xf32> to vector<64x1xf32>
    %53 = tpu.reciprocal %52 {approx = true} : vector<64x1xf32> -> vector<64x1xf32>
    %54 = vector.broadcast %53 : vector<64x1xf32> to vector<64x64xf32>
    %55 = arith.mulf %50, %54 : vector<64x64xf32>
    %cst_20 = arith.constant dense<0.000000e+00> : vector<8x64xf32>
    %56 = tpu.matmul %44, %55, %cst_20 {dimension_numbers = #tpu.dot_dimension_numbers<[1], [1], [0], [0], [0, 0, 1, 0], [], []>} : vector<8x64xf32>, vector<64x64xf32>, vector<8x64xf32> -> vector<8x64xf32>
    %57 = tpu.concatenate %41, %56 in 0 : vector<8x64xf32>, vector<8x64xf32> -> vector<16x64xf32>
    %c0_21 = arith.constant 0 : index
    %c0_22 = arith.constant 0 : index
    %c0_23 = arith.constant 0 : index
    %58 = vector.load %arg7[%c0_21, %c0_22, %c0_23] : memref<1x16x64xf32, #tpu.memory_space<vmem>>, vector<1x16x64xf32>
    %59 = vector.shape_cast %58 : vector<1x16x64xf32> to vector<16x64xf32>
    %60 = vector.shape_cast %57 : vector<16x64xf32> to vector<1x16x64xf32>
    tpu.vector_store %arg7[%c0_21, %c0_22, %c0_23], %60 {strides = array<i32>} : memref<1x16x64xf32, #tpu.memory_space<vmem>>, vector<1x16x64xf32>,
    %c0_24 = arith.constant 0 : index
    %c0_25 = arith.constant 0 : index
    %61 = vector.load %arg4[%c0_24, %c0_25] : memref<32x16xf32, #tpu.memory_space<vmem>>, vector<32x16xf32>
    %cst_26 = arith.constant dense<0.000000e+00> : vector<32x64xf32>
    %62 = tpu.matmul %61, %57, %cst_26 {dimension_numbers = #tpu.dot_dimension_numbers<[1], [0], [0], [1], [0, 0, 1, 1], [], []>} : vector<32x16xf32>, vector<16x64xf32>, vector<32x64xf32> -> vector<32x64xf32>
    %c0_27 = arith.constant 0 : index
    %c0_28 = arith.constant 0 : index
    %63 = vector.load %arg5[%c0_27, %c0_28] : memref<32x1xf32, #tpu.memory_space<vmem>>, vector<32x1xf32>
    %64 = vector.broadcast %63 : vector<32x1xf32> to vector<32x64xf32>
    %65 = arith.addf %62, %64 : vector<32x64xf32>
    %66 = arith.addf %65, %1 : vector<32x64xf32>
    %c0_29 = arith.constant 0 : index
    %c0_30 = arith.constant 0 : index
    %c0_31 = arith.constant 0 : index
    %67 = vector.load %arg6[%c0_29, %c0_30, %c0_31] : memref<1x32x64xf32, #tpu.memory_space<vmem>>, vector<1x32x64xf32>
    %68 = vector.shape_cast %67 : vector<1x32x64xf32> to vector<32x64xf32>
    %69 = vector.shape_cast %66 : vector<32x64xf32> to vector<1x32x64xf32>
    tpu.vector_store %arg6[%c0_29, %c0_30, %c0_31], %69 {strides = array<i32>} : memref<1x32x64xf32, #tpu.memory_space<vmem>>, vector<1x32x64xf32>,
    return
  }
  func.func @transform_0(%arg0: i32) -> (i32, i32, i32) {
    %c0_i32 = arith.constant 0 : i32
    %c0_i32_0 = arith.constant 0 : i32
    %c0_i32_1 = arith.constant 0 : i32
    return %arg0, %c0_i32, %c0_i32_0 : i32, i32, i32
  }
  func.func @transform_1(%arg0: i32) -> (i32, i32) {
    %c0_i32 = arith.constant 0 : i32
    %c0_i32_0 = arith.constant 0 : i32
    %c0_i32_1 = arith.constant 0 : i32
    return %c0_i32, %c0_i32_0 : i32, i32
  }
  func.func @transform_2(%arg0: i32) -> (i32, i32) {
    %c0_i32 = arith.constant 0 : i32
    %c0_i32_0 = arith.constant 0 : i32
    %c0_i32_1 = arith.constant 0 : i32
    return %c0_i32, %c0_i32_0 : i32, i32
  }
  func.func @transform_3(%arg0: i32) -> (i32, i32) {
    %c0_i32 = arith.constant 0 : i32
    %c0_i32_0 = arith.constant 0 : i32
    %c0_i32_1 = arith.constant 0 : i32
    return %c0_i32, %c0_i32_0 : i32, i32
  }
  func.func @transform_4(%arg0: i32) -> (i32, i32) {
    %c0_i32 = arith.constant 0 : i32
    %c0_i32_0 = arith.constant 0 : i32
    %c0_i32_1 = arith.constant 0 : i32
    return %c0_i32, %c0_i32_0 : i32, i32
  }
  func.func @transform_5(%arg0: i32) -> (i32, i32, i32) {
    %c0_i32 = arith.constant 0 : i32
    %c0_i32_0 = arith.constant 0 : i32
    %c0_i32_1 = arith.constant 0 : i32
    return %arg0, %c0_i32, %c0_i32_0 : i32, i32, i32
  }
  func.func @transform_6(%arg0: i32) -> (i32, i32, i32) {
    %c0_i32 = arith.constant 0 : i32
    %c0_i32_0 = arith.constant 0 : i32
    %c0_i32_1 = arith.constant 0 : i32
    return %arg0, %c0_i32, %c0_i32_0 : i32, i32, i32
  }
}

</mosaic_0001>

<bundles_post_ra>
// kernel: tpu_custom_call.1
= control target key start
LH: loop header
LB: loop body
LE: loop exit
PB: predicated region body
PF: predicated region fallthrough
CT: control target
= control target key end

     0   :  { %12 = vsyncpa [#allocation3], 0  ;;  %s2394_s0 = inlined_call_operand.vmem [shape: f32[2,32,64], index: 0, kind: input, shape index: {}]   ;;  %s2395_s1 = inlined_call_operand.vmem [shape: f32[48,32], index: 1, kind: input, shape index: {}]   ;;  %s2396_s2 = inlined_call_operand.vmem [shape: f32[48,1], index: 2, kind: input, shape index: {}]   ;;  %s2397_s3 = inlined_call_operand.vmem [shape: f32[32,16], index: 3, kind: input, shape index: {}]   ;;  %s2398_s4 = inlined_call_operand.vmem [shape: f32[32,1], index: 4, kind: input, shape index: {}]   ;;  %s2399_s5 = inlined_call_operand.hbm [shape: f32[2,32,64], index: 5, kind: output, shape index: {0}]   ;;  %s2400_s6 = inlined_call_operand.hbm [shape: f32[2,16,64], index: 6, kind: output, shape index: {1}]  }
   0x1   :  { %14 = vsyncpa [#allocation3 + $0x1], 0 }
   0x2   :  { %15 = vsyncpa [#allocation5], 0 }
   0x3   :  { %17 = vsyncpa [#allocation5 + $0x1], 0  ;;  %s1955_s21 = smov 0   ;;  %s1957_s22 = smov 0  }
   0x4   :  { %s1959_s23 = smov 0   ;;  %s1961_s24 = smov 0  }
   0x5 LB: > { %s1976_s25 = sadd.s32 4294967295, %s1910_s24   ;;  %s1440_s26 = sadd.s32 4294967294, %s1910_s24   ;;  %s1910_s24 = sphi %s1961_s24, %s2408_s24   ;;  %s1906_s23 = sphi %s1959_s23, %s2407_s23   ;;  %s1902_s22 = sphi %s1957_s22, %s2406_s22   ;;  %s1898_s21 = sphi %s1955_s21, %s2405_s21  }
   0x6   : > { %s1980_s27 = sadd.s32 1, %s1910_s24   ;;  %s140_s28 = sadd.s32 1, %s1906_s23 }
   0x7   : > { %s137_s29 = ssub.s32 %s1910_s24, %s1980_s27  ;;  %p150_p0 = scmp.ne.s32.totalorder %s1906_s23, %s1902_s22 }
   0x8   : > { %p138_p1 = scmp.eq.s32.totalorder %s137_s29, 0  ;;  %p151_p2 = scmp.eq.s32.totalorder %s1976_s25, 1 }
   0x9   : > { %p156_p3 = scmp.ne.s32.totalorder %s1902_s22, %s1898_s21  ;;  %p157_p4 = scmp.eq.s32.totalorder %s1440_s26, 1 }
   0xa   : > { %s1991_s30 = scalar_select %p138_p1, %s1906_s23, %s140_s28  }
   0xb   : > { %p1993_p5 = por %p151_p2, %p150_p0  ;;  %p1997_p6 = por %p157_p4, %p156_p3 }
   0xc   : > { %p1443_p7 = scmp.ge.s32.totalorder %s1910_s24, 1  ;;  %p221_p8 = scmp.lt.s32.totalorder %s1910_s24, 3 }
   0xe   : > { %p222_p9 = pnand %p1443_p7, %p221_p8 }
   0xf   : > { %p256_p10 = scmp.lt.s32.totalorder (!%p222_p9), %s1976_s25, 1  ;;  %vm265_vm0 = vcmask (!%p222_p9), 523264   ;;  %v326_v28 = vld [vmem:[%s2395_s1] sm:$0xff] (!%p222_p9)  ;;  %vm368_vm1 = vcmask (!%p222_p9), 261120   ;;  %v333_v29 = vld [vmem:[%s2396_s2 + $0x8] sm:$0xff] (!%p222_p9)  ;;  %v1912_v30 = vmov (!%p222_p9), 0  }
  0x10   : > { %225 = sbr.rel (%p222_p9) target bundleno = 1726 (0x6be), region = 40  ;;  %1563 = vmatprep.mubr.msk.f32.mxu0 (!%p222_p9), %vm368_vm1, %v326_v28  ;;  %1743 = vset.pattern.permute.xlu1 (!%p222_p9), %v1912_v30  ;;  %v332_v31 = vld [vmem:[%s2396_s2] sm:$0xff] (!%p222_p9)  ;;  %v334_v32 = vld [vmem:[%s2396_s2 + $0x10] sm:$0xff] (!%p222_p9)  ;;  %v335_v33 = vld [vmem:[%s2396_s2 + $0x18] sm:$0xff] (!%p222_p9)  ;;  %vm514_vm2 = vcmask (!%p222_p9), 64512   ;;  %vm1914_vm3 = vmmov (!%p222_p9), 0  }
  0x11   : > { %1742 = vset.pattern.permute.xlu0 (!%p222_p9), %v1912_v30  ;;  %v327_v56 = vld [vmem:[%s2395_s1 + $0x8] sm:$0xff] (!%p222_p9)  ;;  %v328_v57 = vld [vmem:[%s2395_s1 + $0x10] sm:$0xff] (!%p222_p9)  ;;  %v329_v58 = vld [vmem:[%s2395_s1 + $0x18] sm:$0xff] (!%p222_p9)  ;;  %vm1205_vm5 = vcmask (!%p222_p9), 130048   ;;  %s2281_s18 = sand.u32 (!%p222_p9), 1, %s1902_s22   ;;  %s1916_s26 = smov (!%p222_p9), [#allocation4]  }
  0x12   : > { %v330_v59 = vld [vmem:[%s2395_s1 + $0x20] sm:$0xff] (!%p222_p9)  ;;  %v331_v60 = vld [vmem:[%s2395_s1 + $0x28] sm:$0xff] (!%p222_p9)  ;;  %vm2232_vm4 = vmpackc.low (!%p222_p9), %vm265_vm0, %vm265_vm0  ;;  %s1445_s19 = sshll.u32 (!%p222_p9), %s2281_s18, 4  ;;  %s1317_s17 = scalar_lea.sflag (!%p222_p9), [#allocation5], %s2281_s18 }
  0x13   : > { %s255_s20 = scalar_lea.vmem (!%p222_p9), [#allocation4], %s1445_s19  ;;  %s1820_s28 = sshll.u32 (!%p222_p9), %s1916_s26, 4  ;;  %s1821_s28 = int_to_ptr.vmem [resolvable:$false] %s1820_s28 }
  0x14   : > { %s1346_s12 = sshll.u32 (!%p222_p9), %s255_s20, 4  ;;  %s2298_s12 = int_to_ptr.vmem [resolvable:$true] %s1346_s12 }
  0x15   : > { %s1816_s19 = scalar_lea.vmem (!%p222_p9), %s2298_s12, 256  ;;  %p1823_p0 = scmp.lt.s32.totalorder (!%p222_p9), %s2298_s12, %s1821_s28 }
  0x16   : > { %p1817_p11 = scmp.ne.s32.totalorder (!%p222_p9), %s2298_s12, %s1816_s19 }
  0x17   : > { %s257_s9 = scalar_select %p256_p10, %s1976_s25, 1 }
  0x18   : > { %p1818_p12 = pnand %p1817_p11, %p1993_p5 }
  0x19   : > { %s1500_s10 = sshll.u32 %s257_s9, 5 }
  0x1a   : > { %s260_s13 = scalar_lea.vmem %s2394_s0, %s1500_s10  ;;  %p1819_p13 = pneg %p1818_p12 }
  0x1b   : > { %v2008_v0 = vld [vmem:[%s260_s13] sm:$0xff]  ;;  %v2010_v1 = vld [vmem:[%s260_s13 + $0x10] sm:$0xff]  ;;  %v2012_v2 = vld [vmem:[%s260_s13 + $0x8] sm:$0xff] }
  0x1c   : > { %v266_v3 = vsel %vm265_vm0, %v2008_v0, 0.0  ;;  %v272_v4 = vsel %vm265_vm0, %v2010_v1, 0.0  ;;  %v2018_v5 = vld [vmem:[%s260_s13 + $0x18] sm:$0xff]  ;;  %v269_v6 = vsel %vm265_vm0, %v2012_v2, 0.0  ;;  %s1502_s13 = sshll.u32 %s1976_s25, 8 }
  0x1d   : > { %267 = vadd.xlane.f32.xlu0 %v266_v3  ;;  %273 = vadd.xlane.f32.xlu1 %v272_v4  ;;  %v275_v7 = vsel %vm265_vm0, %v2018_v5, 0.0  ;;  %s2304_s16 = scalar_lea.hbm %s2400_s6, %s1502_s13 }
  0x21   : > { %270 = vadd.xlane.f32.xlu0 %v269_v6  ;;  %276 = vadd.xlane.f32.xlu1 %v275_v7 }
  0xaa   : > { %v268_v8 = vpop.xlane.xlu0 %267  ;;  %v274_v9 = vpop.xlane.xlu1 %273 }
  0xab   : > { %v282_v10 = vmul.f32 0.015625, %v268_v8  ;;  %v284_v11 = vmul.f32 0.015625, %v274_v9 }
  0xad   : > { %v286_v12 = vsub.f32 %v2008_v0, %v282_v10  ;;  %v288_v13 = vsub.f32 %v2010_v1, %v284_v11 }
  0xae   : > { %v271_v14 = vpop.xlane.xlu0 %270  ;;  %v277_v15 = vpop.xlane.xlu1 %276 }
  0xaf   : > { %v283_v16 = vmul.f32 0.015625, %v271_v14  ;;  %v285_v17 = vmul.f32 0.015625, %v277_v15  ;;  %v290_v18 = vmul.f32 %v286_v12, %v286_v12  ;;  %v292_v19 = vmul.f32 %v288_v13, %v288_v13 }
  0xb1   : > { %v287_v20 = vsub.f32 %v2012_v2, %v283_v16  ;;  %v289_v21 = vsub.f32 %v2018_v5, %v285_v17  ;;  %v294_v22 = vsel %vm265_vm0, %v290_v18, 0.0  ;;  %v300_v23 = vsel %vm265_vm0, %v292_v19, 0.0 }
  0xb2   : > { %295 = vadd.xlane.f32.xlu0 %v294_v22 }
  0xb3   : > { %v291_v24 = vmul.f32 %v287_v20, %v287_v20  ;;  %v293_v25 = vmul.f32 %v289_v21, %v289_v21 }
  0xb5   : > { %v297_v26 = vsel %vm265_vm0, %v291_v24, 0.0  ;;  %v303_v27 = vsel %vm265_vm0, %v293_v25, 0.0 }
  0xb6   : > { %301 = vadd.xlane.f32.xlu0 %v300_v23  ;;  %298 = vadd.xlane.f32.xlu1 %v297_v26 }
  0xba   : > { %304 = vadd.xlane.f32.xlu1 %v303_v27 }
  0xcb   : > { %345 = vperm.xlu1 %1743, %v333_v29  }
  0xcc   : > { %340 = vperm.xlu0 %1742, %v332_v31  }
  0xcf   : > { %350 = vperm.xlu1 %1743, %v334_v32  }
  0xd3   : > { %355 = vperm.xlu1 %1743, %v335_v33  }
 0x13f   : > { %v296_v34 = vpop.xlane.xlu0 %295 }
 0x140   : > { %v310_v35 = vmul.f32 0.015625, %v296_v34 }
 0x142   : > { %v314_v36 = vadd.f32 1e-05, %v310_v35 }
 0x143   : > { %v299_v37 = vpop.xlane.xlu1 %298  ;;  %v302_v38 = vpop.xlane.xlu0 %301 }
 0x144   : > { %v311_v39 = vmul.f32 0.015625, %v299_v37  ;;  %v312_v40 = vmul.f32 0.015625, %v302_v38  ;;  %1744 = vrsqrt.f32 %v314_v36 }
 0x146   : > { %v315_v41 = vadd.f32 1e-05, %v311_v39  ;;  %v316_v42 = vadd.f32 1e-05, %v312_v40 }
 0x147   : > { %v305_v43 = vpop.xlane.xlu1 %304 }
 0x148   : > { %1746 = vrsqrt.f32 %v315_v41  ;;  %v313_v44 = vmul.f32 0.015625, %v305_v43 }
 0x149   : > { %1748 = vrsqrt.f32 %v316_v42 }
 0x14a   : > { %v317_v45 = vadd.f32 1e-05, %v313_v44 }
 0x14b   : > { %v346_v61 = vpop.permute.xlu1 %345  ;;  %v341_v63 = vpop.permute.xlu0 %340 }
 0x14c   : > { %1750 = vrsqrt.f32 %v317_v45 }
 0x14e   : > { %v1745_v46 = vpop.eup %1744 }
 0x14f   : > { %v322_v48 = vmul.f32 %v1745_v46, %v286_v12  ;;  %v351_v62 = vpop.permute.xlu1 %350 }
 0x152   : > { %v1747_v47 = vpop.eup %1746 }
 0x153   : > { %v323_v49 = vmul.f32 %v1747_v47, %v287_v20  ;;  %v1749_v50 = vpop.eup %1748  ;;  %v356_v8 = vpop.permute.xlu1 %355 }
 0x154   : > { %v324_v53 = vmul.f32 %v1749_v50, %v288_v13 }
 0x155   : > { %v1648_v51 = vpack.c.bf16 %v323_v49, %v322_v48 }
 0x156   : > { %v1751_v52 = vpop.eup %1750 }
 0x157   : > { %1649 = vmatprep.subr.bf16.mxu0 %v1648_v51  ;;  %v325_v54 = vmul.f32 %v1751_v52, %v289_v21 }
 0x158   : > { %1651 = vmatpush3.bf16.msra.mxu0 %v1648_v51 }
 0x159   : > { %v1652_v55 = vpack.c.bf16 %v325_v54, %v324_v53 }
 0x15b   : > { %1653 = vmatprep.subr.bf16.mxu0 %v1652_v55 }
 0x15c   : > { %1655 = vmatpush3.bf16.msra.mxu0 %v1652_v55 }
 0x15f   : > { %1564 = vmatmul.mubr.msk.f32.vlgmr.msra.gmra.mrb[0].mxu0 %vm368_vm1, %v327_v56 }
 0x160   : > { %1566 = vmatprep.mubr.msk.f32.mxu0 %vm368_vm1, %v328_v57 }
 0x163   : > { %1567 = vmatmul.mubr.msk.f32.gmra.mrb[2].mxu0 %vm368_vm1, %v329_v58 }
 0x164   : > { %1569 = vmatprep.mubr.msk.f32.mxu0 %vm368_vm1, %v330_v59 }
 0x167   : > { %1570 = vmatmul.mubr.msk.f32.gmra.mrb[4].mxu0 %vm368_vm1, %v331_v60 }
 0x232   : > { %v1565_v3 = vpop.f32.mrb[0].mxu0 }
 0x233   : > { %v459_v4 = vadd.f32 %v1565_v3, %v346_v61  ;;  %v453_v6 = vpop.f32.mrb[1].mxu0 }
 0x234   : > { %v454_v7 = vadd.f32 %v453_v6, %v341_v63 }
 0x235   : > { %829 = vxpose.xlu0.b32.start.end [1/1] (short) (narrow) %v459_v4, 64 }
 0x236   : > { %v1568_v9 = vpop.f32.mrb[2].mxu0  ;;  %482 = vxpose.xlu1.b32.start.end [1/1] (short) (narrow) %v454_v7, 64 }
 0x237   : > { %v469_v10 = vadd.f32 %v1568_v9, %v356_v8  ;;  %v463_v11 = vpop.f32.mrb[3].mxu0 }
 0x238   : > { %v464_v12 = vadd.f32 %v463_v11, %v351_v62 }
 0x239   : > { %1605 = vmatprep.subr.mxu0 %v469_v10 }
 0x23a   : > { %1572 = vmatprep.subr.mxu1 %v464_v12  ;;  %1606 = vmatpush3.msra.mxu0 %v469_v10  ;;  %v2068_v13 = vpop.f32.mrb[4].mxu0 }
 0x23b   : > { %1573 = vmatpush3.msra.mxu1 %v464_v12  ;;  %v2070_v14 = vpop.f32.mrb[5].mxu0 }
 0x2b5   : > { %v845_v15 = vpop.trf.xlu0 }
 0x2b6   : > { %v498_v16 = vpop.trf.xlu1  ;;  %1607 = vmatprep.mubr.msk.f32.mxu0 %vm514_vm2, %v845_v15 }
 0x2b7   : > { %1574 = vmatprep.mubr.msk.f32.mxu1 %vm514_vm2, %v498_v16 }
 0x2b9   : > { %v846_v17 = vpop.trf.xlu0 }
 0x2ba   : > { %v499_v18 = vpop.trf.xlu1  ;;  %1608 = vmatmul.mubr.msk.f32.vlgmr.msra.gmra.mrb[6].mxu0 %vm514_vm2, %v846_v17 }
 0x2bb   : > { %1575 = vmatmul.mubr.msk.f32.vlgmr.msra.gmra.mrb[0].mxu1 %vm514_vm2, %v499_v18 }
 0x2bd   : > { %v847_v19 = vpop.trf.xlu0 }
 0x2be   : > { %v500_v20 = vpop.trf.xlu1  ;;  %1610 = vmatprep.mubr.msk.f32.mxu0 %vm514_vm2, %v847_v19 }
 0x2bf   : > { %1577 = vmatprep.mubr.msk.f32.mxu1 %vm514_vm2, %v500_v20 }
 0x2c1   : > { %v848_v21 = vpop.trf.xlu0 }
 0x2c2   : > { %v501_v22 = vpop.trf.xlu1  ;;  %1611 = vmatmul.mubr.msk.f32.gmra.mrb[8].mxu0 %vm514_vm2, %v848_v21 }
 0x2c3   : > { %1578 = vmatmul.mubr.msk.f32.gmra.mrb[2].mxu1 %vm514_vm2, %v501_v22 }
 0x2c5   : > { %v849_v23 = vpop.trf.xlu0 }
 0x2c6   : > { %v502_v24 = vpop.trf.xlu1  ;;  %1613 = vmatprep.mubr.msk.f32.mxu0 %vm514_vm2, %v849_v23 }
 0x2c7   : > { %1580 = vmatprep.mubr.msk.f32.mxu1 %vm514_vm2, %v502_v24 }
 0x2c9   : > { %v850_v25 = vpop.trf.xlu0 }
 0x2ca   : > { %v503_v26 = vpop.trf.xlu1  ;;  %1614 = vmatmul.mubr.msk.f32.gmra.mrb[10].mxu0 %vm514_vm2, %v850_v25 }
 0x2cb   : > { %1581 = vmatmul.mubr.msk.f32.gmra.mrb[4].mxu1 %vm514_vm2, %v503_v26 }
 0x2cd   : > { %v851_v27 = vpop.trf.xlu0 }
 0x2ce   : > { %v504_v28 = vpop.trf.xlu1  ;;  %1616 = vmatprep.mubr.msk.f32.mxu0 %vm514_vm2, %v851_v27 }
 0x2cf   : > { %1583 = vmatprep.mubr.msk.f32.mxu1 %vm514_vm2, %v504_v28 }
 0x2d1   : > { %v852_v29 = vpop.trf.xlu0 }
 0x2d2   : > { %v505_v30 = vpop.trf.xlu1  ;;  %1617 = vmatmul.mubr.msk.f32.gmra.mrb[12].mxu0 %vm514_vm2, %v852_v29 }
 0x2d3   : > { %1584 = vmatmul.mubr.msk.f32.gmra.mrb[6].mxu1 %vm514_vm2, %v505_v30 }
 0x38d   : > { %v1609_v31 = vpop.f32.mrb[6].mxu0 }
 0x38e   : > { %v1576_v32 = vpop.f32.mrb[0].mxu1  ;;  %v951_v33 = vpop.f32.mrb[7].mxu0  ;;  %v993_v34 = vsel %vm265_vm0, %v1609_v31, -inf }
 0x38f   : > { %994 = vmax.xlane.f32.xlu1 %v993_v34  ;;  %v647_v35 = vsel %vm265_vm0, %v1576_v32, -inf  ;;  %v605_v36 = vpop.f32.mrb[1].mxu1  ;;  %v990_v37 = vsel %vm265_vm0, %v951_v33, -inf }
 0x390   : > { %648 = vmax.xlane.f32.xlu0 %v647_v35  ;;  %v644_v38 = vsel %vm265_vm0, %v605_v36, -inf }
 0x393   : > { %991 = vmax.xlane.f32.xlu1 %v990_v37 }
 0x395   : > { %v1612_v39 = vpop.f32.mrb[8].mxu0 }
 0x396   : > { %v961_v40 = vpop.f32.mrb[9].mxu0  ;;  %v2092_v41 = vpop.f32.mrb[2].mxu1  ;;  %v999_v44 = vsel %vm265_vm0, %v1612_v39, -inf }
 0x397   : > { %645 = vmax.xlane.f32.xlu1 %v644_v38  ;;  %v996_v42 = vsel %vm265_vm0, %v961_v40, -inf  ;;  %v2095_v43 = vpop.f32.mrb[3].mxu1  ;;  %v653_v45 = vsel %vm265_vm0, %v2092_v41, -inf }
 0x398   : > { %997 = vmax.xlane.f32.xlu0 %v996_v42  ;;  %v650_v52 = vsel %vm265_vm0, %v2095_v43, -inf }
 0x39b   : > { %1000 = vmax.xlane.f32.xlu1 %v999_v44 }
 0x39d   : > { %v2100_v46 = vpop.f32.mrb[10].mxu0 }
 0x39e   : > { %v2102_v47 = vpop.f32.mrb[11].mxu0  ;;  %v2104_v48 = vpop.f32.mrb[4].mxu1  ;;  %v1005_v53 = vsel %vm265_vm0, %v2100_v46, -inf }
 0x39f   : > { %654 = vmax.xlane.f32.xlu1 %v653_v45  ;;  %v1002_v49 = vsel %vm265_vm0, %v2102_v47, -inf  ;;  %v2108_v50 = vpop.f32.mrb[5].mxu1  ;;  %v659_v59 = vsel %vm265_vm0, %v2104_v48, -inf }
 0x3a0   : > { %1003 = vmax.xlane.f32.xlu0 %v1002_v49  ;;  %v656_v51 = vsel %vm265_vm0, %v2108_v50, -inf }
 0x3a3   : > { %651 = vmax.xlane.f32.xlu1 %v650_v52 }
 0x3a4   : > { %657 = vmax.xlane.f32.xlu0 %v656_v51 }
 0x3a5   : > { %v2116_v54 = vpop.f32.mrb[12].mxu0 }
 0x3a6   : > { %v2118_v55 = vpop.f32.mrb[6].mxu1  ;;  %v2120_v56 = vpop.f32.mrb[13].mxu0  ;;  %v1011_v62 = vsel %vm265_vm0, %v2116_v54, -inf }
 0x3a7   : > { %v2122_v57 = vpop.f32.mrb[7].mxu1  ;;  %1006 = vmax.xlane.f32.xlu1 %v1005_v53  ;;  %v1008_v60 = vsel %vm265_vm0, %v2120_v56, -inf  ;;  %v665_v61 = vsel %vm265_vm0, %v2118_v55, -inf }
 0x3a8   : > { %v662_v58 = vsel %vm265_vm0, %v2122_v57, -inf }
 0x3a9   : > { %663 = vmax.xlane.f32.xlu0 %v662_v58 }
 0x3ab   : > { %660 = vmax.xlane.f32.xlu1 %v659_v59 }
 0x3ad   : > { %1009 = vmax.xlane.f32.xlu0 %v1008_v60 }
 0x3af   : > { %666 = vmax.xlane.f32.xlu1 %v665_v61 }
 0x3b3   : > { %1012 = vmax.xlane.f32.xlu1 %v1011_v62 }
 0x41c   : > { %v995_v63 = vpop.xlane.xlu1 %994 }
 0x41d   : > { %v1015_v3 = vsub.f32 %v1609_v31, %v995_v63  ;;  %v649_v4 = vpop.xlane.xlu0 %648 }
 0x41e   : > { %v669_v6 = vsub.f32 %v1576_v32, %v649_v4 }
 0x41f   : > { %v1024_v7 = vmul.f32 1.442695, %v1015_v3 }
 0x420   : > { %v678_v8 = vmul.f32 1.442695, %v669_v6  ;;  %v992_v9 = vpop.xlane.xlu1 %991 }
 0x421   : > { %1752 = vpow2.f32 %v1024_v7  ;;  %v1014_v10 = vsub.f32 %v951_v33, %v992_v9 }
 0x422   : > { %1754 = vpow2.f32 %v678_v8 }
 0x423   : > { %v1022_v11 = vmul.f32 1.442695, %v1014_v10 }
 0x424   : > { %v646_v12 = vpop.xlane.xlu1 %645 }
 0x425   : > { %1756 = vpow2.f32 %v1022_v11  ;;  %v668_v15 = vsub.f32 %v605_v36, %v646_v12  ;;  %v998_v16 = vpop.xlane.xlu0 %997 }
 0x426   : > { %v1016_v17 = vsub.f32 %v961_v40, %v998_v16 }
 0x427   : > { %v676_v18 = vmul.f32 1.442695, %v668_v15 }
 0x428   : > { %v1026_v19 = vmul.f32 1.442695, %v1016_v17  ;;  %v1001_v20 = vpop.xlane.xlu1 %1000 }
 0x429   : > { %1758 = vpow2.f32 %v676_v18  ;;  %v1017_v21 = vsub.f32 %v1612_v39, %v1001_v20 }
 0x42a   : > { %1760 = vpow2.f32 %v1026_v19 }
 0x42b   : > { %v2134_v22 = vpop.eup %1752  ;;  %v1028_v23 = vmul.f32 1.442695, %v1017_v21 }
 0x42c   : > { %v655_v24 = vpop.xlane.xlu1 %654  ;;  %v1041_v25 = vsel %vm265_vm0, %v2134_v22, 0.0  ;;  %v2138_v26 = vpop.eup %1754 }
 0x42d   : > { %1762 = vpow2.f32 %v1028_v23  ;;  %v671_v27 = vsub.f32 %v2092_v41, %v655_v24  ;;  %1042 = vadd.xlane.f32.xlu1 %v1041_v25  ;;  %v1004_v28 = vpop.xlane.xlu0 %1003  ;;  %v695_v34 = vsel %vm265_vm0, %v2138_v26, 0.0  ;;  %v1913_v23 = vmov 0.0|0.0  }
 0x42e   : > { %v1018_v31 = vsub.f32 %v2102_v47, %v1004_v28  ;;  %1672 = vmatprep.subr.bf16.mxu0 %v1913_v23  ;;  %1656 = vmatprep.subr.bf16.mxu1 %v1913_v23 }
 0x42f   : > { %v2141_v29 = vpop.eup %1756  ;;  %v682_v30 = vmul.f32 1.442695, %v671_v27 }
 0x430   : > { %v652_v32 = vpop.xlane.xlu1 %651  ;;  %v1038_v33 = vsel %vm265_vm0, %v2141_v29, 0.0  ;;  %v1030_v38 = vmul.f32 1.442695, %v1018_v31  ;;  %v337_v31 = vld [vmem:[%s2396_s2 + $0x28] sm:$0xff] }
 0x431   : > { %1764 = vpow2.f32 %v682_v30  ;;  %v670_v35 = vsub.f32 %v2095_v43, %v652_v32  ;;  %1039 = vadd.xlane.f32.xlu0 %v1038_v33  ;;  %696 = vadd.xlane.f32.xlu1 %v695_v34  ;;  %v658_v36 = vpop.xlane.xlu0 %657  ;;  %v336_v32 = vld [vmem:[%s2396_s2 + $0x20] sm:$0xff]  ;;  %v1182_v34 = vld [vmem:[%s2398_s4 + $0x8] sm:$0xff] }
 0x432   : > { %v672_v40 = vsub.f32 %v2108_v50, %v658_v36  ;;  %v1181_v33 = vld [vmem:[%s2398_s4] sm:$0xff]  ;;  %v1184_v36 = vld [vmem:[%s2398_s4 + $0x18] sm:$0xff] }
 0x433   : > { %v2149_v37 = vpop.eup %1758  ;;  %v680_v39 = vmul.f32 1.442695, %v670_v35  ;;  %v1183_v35 = vld [vmem:[%s2398_s4 + $0x10] sm:$0xff] }
 0x434   : > { %v1007_v41 = vpop.xlane.xlu1 %1006  ;;  %v692_v42 = vsel %vm265_vm0, %v2149_v37, 0.0  ;;  %v2154_v44 = vpop.eup %1760  ;;  %v684_v49 = vmul.f32 1.442695, %v672_v40 }
 0x435   : > { %1766 = vpow2.f32 %v680_v39  ;;  %v1019_v45 = vsub.f32 %v2100_v46, %v1007_v41  ;;  %693 = vadd.xlane.f32.xlu0 %v692_v42  ;;  %v1044_v53 = vsel %vm265_vm0, %v2154_v44, 0.0 }
 0x436   : > { %v664_v43 = vpop.xlane.xlu0 %663  ;;  %1768 = vpow2.f32 %v1030_v38  ;;  %v1915_v38 = vmov 0.0  }
 0x437   : > { %v2157_v47 = vpop.eup %1762  ;;  %v1032_v51 = vmul.f32 1.442695, %v1019_v45  ;;  %v674_v60 = vsub.f32 %v2122_v57, %v664_v43  ;;  %1635 = vmatprep.mubr.msk.f32.mxu0 %vm1914_vm3, %v1915_v38  ;;  %1602 = vmatprep.mubr.msk.f32.mxu1 %vm1914_vm3, %v1915_v38 }
 0x438   : > { %v661_v52 = vpop.xlane.xlu1 %660  ;;  %v1047_v50 = vsel %vm265_vm0, %v2157_v47, 0.0 }
 0x439   : > { %1770 = vpow2.f32 %v1032_v51  ;;  %v673_v58 = vsub.f32 %v2104_v48, %v661_v52  ;;  %1048 = vadd.xlane.f32.xlu1 %v1047_v50  ;;  %1045 = vadd.xlane.f32.xlu0 %v1044_v53  ;;  %v688_v48 = vmul.f32 1.442695, %v674_v60 }
 0x43a   : > { %v1010_v46 = vpop.xlane.xlu0 %1009  ;;  %1772 = vpow2.f32 %v684_v49 }
 0x43b   : > { %v2164_v59 = vpop.eup %1764  ;;  %v686_v61 = vmul.f32 1.442695, %v673_v58  ;;  %v1020_v62 = vsub.f32 %v2120_v56, %v1010_v46 }
 0x43c   : > { %v667_v63 = vpop.xlane.xlu1 %666  ;;  %v701_v3 = vsel %vm265_vm0, %v2164_v59, 0.0 }
 0x43d   : > { %1774 = vpow2.f32 %v686_v61  ;;  %v1034_v4 = vmul.f32 1.442695, %v1020_v62  ;;  %702 = vadd.xlane.f32.xlu1 %v701_v3  ;;  %v675_v7 = vsub.f32 %v2118_v55, %v667_v63 }
 0x43f   : > { %v2170_v6 = vpop.eup %1766  ;;  %1776 = vpow2.f32 %v1034_v4  ;;  %v690_v11 = vmul.f32 1.442695, %v675_v7 }
 0x440   : > { %v1013_v8 = vpop.xlane.xlu1 %1012  ;;  %v698_v57 = vsel %vm265_vm0, %v2170_v6, 0.0  ;;  %v2175_v9 = vpop.eup %1768  ;;  %1778 = vpow2.f32 %v688_v48 }
 0x441   : > { %v1021_v56 = vsub.f32 %v2116_v54, %v1013_v8  ;;  %699 = vadd.xlane.f32.xlu0 %v698_v57  ;;  %v1050_v55 = vsel %vm265_vm0, %v2175_v9, 0.0 }
 0x443   : > { %v2178_v10 = vpop.eup %1770  ;;  %v1036_v12 = vmul.f32 1.442695, %v1021_v56 }
 0x444   : > { %v1053_v15 = vsel %vm265_vm0, %v2178_v10, 0.0  ;;  %v2184_v16 = vpop.eup %1772 }
 0x445   : > { %1780 = vpow2.f32 %v1036_v12  ;;  %1054 = vadd.xlane.f32.xlu1 %v1053_v15  ;;  %1051 = vadd.xlane.f32.xlu0 %v1050_v55  ;;  %v704_v18 = vsel %vm265_vm0, %v2184_v16, 0.0 }
 0x446   : > { %1782 = vpow2.f32 %v690_v11 }
 0x447   : > { %v2186_v17 = vpop.eup %1774 }
 0x448   : > { %v707_v54 = vsel %vm265_vm0, %v2186_v17, 0.0 }
 0x449   : > { %v2192_v19 = vpop.eup %1776  ;;  %708 = vadd.xlane.f32.xlu1 %v707_v54  ;;  %705 = vadd.xlane.f32.xlu0 %v704_v18 }
 0x44a   : > { %v1056_v20 = vsel %vm265_vm0, %v2192_v19, 0.0  ;;  %v2196_v21 = vpop.eup %1778 }
 0x44b   : > { %v710_v27 = vsel %vm265_vm0, %v2196_v21, 0.0 }
 0x44d   : > { %1057 = vadd.xlane.f32.xlu0 %v1056_v20 }
 0x44f   : > { %v2200_v24 = vpop.eup %1780 }
 0x450   : > { %v1059_v25 = vsel %vm265_vm0, %v2200_v24, 0.0  ;;  %v2206_v28 = vpop.eup %1782 }
 0x451   : > { %1060 = vadd.xlane.f32.xlu1 %v1059_v25  ;;  %711 = vadd.xlane.f32.xlu0 %v710_v27  ;;  %v713_v30 = vsel %vm265_vm0, %v2206_v28, 0.0 }
 0x455   : > { %714 = vadd.xlane.f32.xlu1 %v713_v30 }
 0x466   : > { %365 = vperm.xlu1 %1743, %v337_v31  }
 0x467   : > { %360 = vperm.xlu0 %1742, %v336_v32  }
 0x46a   : > { %1187 = vperm.xlu1 %1743, %v1181_v33  }
 0x46b   : > { %1192 = vperm.xlu0 %1742, %v1182_v34  }
 0x46e   : > { %1197 = vperm.xlu1 %1743, %v1183_v35  }
 0x46f   : > { %1202 = vperm.xlu0 %1742, %v1184_v36  }
 0x4ba   : > { %v1043_v39 = vpop.xlane.xlu1 %1042 }
 0x4bb   : > { %1784 = vrcp.f32 %v1043_v39 }
 0x4be   : > { %v697_v40 = vpop.xlane.xlu1 %696  ;;  %v1040_v41 = vpop.xlane.xlu0 %1039 }
 0x4bf   : > { %1786 = vrcp.f32 %v1040_v41 }
 0x4c0   : > { %1788 = vrcp.f32 %v697_v40 }
 0x4c2   : > { %v694_v42 = vpop.xlane.xlu0 %693 }
 0x4c3   : > { %1790 = vrcp.f32 %v694_v42 }
 0x4c5   : > { %v1785_v49 = vpop.eup %1784 }
 0x4c6   : > { %v1049_v45 = vpop.xlane.xlu1 %1048  ;;  %v1046_v43 = vpop.xlane.xlu0 %1045  ;;  %v1071_v53 = vmul.f32 %v1785_v49, %v2134_v22 }
 0x4c7   : > { %1792 = vrcp.f32 %v1049_v45 }
 0x4c8   : > { %1794 = vrcp.f32 %v1046_v43 }
 0x4c9   : > { %v1787_v51 = vpop.eup %1786 }
 0x4ca   : > { %v703_v52 = vpop.xlane.xlu1 %702  ;;  %v1789_v50 = vpop.eup %1788  ;;  %v1070_v58 = vmul.f32 %v1787_v51, %v2141_v29  ;;  %v1178_v51 = vld [vmem:[%s2397_s3 + $0x8] sm:$0xff] }
 0x4cb   : > { %1796 = vrcp.f32 %v703_v52  ;;  %v725_v62 = vmul.f32 %v1789_v50, %v2138_v26  ;;  %v1179_v52 = vld [vmem:[%s2397_s3 + $0x10] sm:$0xff]  ;;  %v1180_v50 = vld [vmem:[%s2397_s3 + $0x18] sm:$0xff] }
 0x4cc   : > { %v1673_v61 = vpack.c.bf16 %v1071_v53, %v1070_v58 }
 0x4cd   : > { %v1791_v60 = vpop.eup %1790 }
 0x4ce   : > { %v724_v63 = vmul.f32 %v1791_v60, %v2149_v37  ;;  %v700_v3 = vpop.xlane.xlu0 %699  ;;  %1675 = vmatpush3.bf16.xpose.msk.msra.mxu0 %vm2232_vm4, %v1673_v61 }
 0x4cf   : > { %1798 = vrcp.f32 %v700_v3  ;;  %1676 = vmatprep.subr.bf16.mxu0 %v1913_v23 }
 0x4d0   : > { %v1657_v22 = vpack.c.bf16 %v725_v62, %v724_v63 }
 0x4d1   : > { %v1793_v29 = vpop.eup %1792 }
 0x4d2   : > { %v1795_v4 = vpop.eup %1794  ;;  %v1073_v48 = vmul.f32 %v1793_v29, %v2157_v47  ;;  %v1055_v7 = vpop.xlane.xlu1 %1054  ;;  %1659 = vmatpush3.bf16.xpose.msk.msra.mxu1 %vm2232_vm4, %v1657_v22 }
 0x4d3   : > { %v1052_v8 = vpop.xlane.xlu0 %1051  ;;  %v1072_v26 = vmul.f32 %v1795_v4, %v2154_v44  ;;  %1800 = vrcp.f32 %v1055_v7  ;;  %1660 = vmatprep.subr.bf16.mxu1 %v1913_v23 }
 0x4d4   : > { %1802 = vrcp.f32 %v1052_v8 }
 0x4d5   : > { %v1677_v37 = vpack.c.bf16 %v1073_v48, %v1072_v26  ;;  %v1797_v11 = vpop.eup %1796 }
 0x4d6   : > { %v709_v57 = vpop.xlane.xlu1 %708  ;;  %v727_v12 = vmul.f32 %v1797_v11, %v2164_v59 }
 0x4d7   : > { %v706_v56 = vpop.xlane.xlu0 %705  ;;  %1804 = vrcp.f32 %v709_v57  ;;  %1679 = vmatpush3.bf16.xpose.msk.msra.mxu0 %vm2232_vm4, %v1677_v37 }
 0x4d8   : > { %1806 = vrcp.f32 %v706_v56  ;;  %1680 = vmatprep.subr.bf16.mxu0 %v1913_v23 }
 0x4d9   : > { %v1799_v47 = vpop.eup %1798 }
 0x4da   : > { %v726_v44 = vmul.f32 %v1799_v47, %v2170_v6 }
 0x4db   : > { %v1058_v15 = vpop.xlane.xlu0 %1057 }
 0x4dc   : > { %v1661_v55 = vpack.c.bf16 %v727_v12, %v726_v44  ;;  %1808 = vrcp.f32 %v1058_v15 }
 0x4dd   : > { %v1801_v54 = vpop.eup %1800 }
 0x4de   : > { %v1803_v18 = vpop.eup %1802  ;;  %v1075_v20 = vmul.f32 %v1801_v54, %v2178_v10  ;;  %v1061_v25 = vpop.xlane.xlu1 %1060  ;;  %1663 = vmatpush3.bf16.xpose.msk.msra.mxu1 %vm2232_vm4, %v1661_v55 }
 0x4df   : > { %v712_v27 = vpop.xlane.xlu0 %711  ;;  %v1074_v30 = vmul.f32 %v1803_v18, %v2175_v9  ;;  %1810 = vrcp.f32 %v1061_v25  ;;  %1664 = vmatprep.subr.bf16.mxu1 %v1913_v23 }
 0x4e0   : > { %1812 = vrcp.f32 %v712_v27 }
 0x4e1   : > { %v1805_v59 = vpop.eup %1804  ;;  %v1681_v6 = vpack.c.bf16 %v1075_v20, %v1074_v30 }
 0x4e2   : > { %v1807_v31 = vpop.eup %1806  ;;  %v729_v32 = vmul.f32 %v1805_v59, %v2186_v17  ;;  %v715_v33 = vpop.xlane.xlu1 %714 }
 0x4e3   : > { %v728_v34 = vmul.f32 %v1807_v31, %v2184_v16  ;;  %1814 = vrcp.f32 %v715_v33  ;;  %1683 = vmatpush3.bf16.xpose.msk.msra.mxu0 %vm2232_vm4, %v1681_v6 }
 0x4e4   : > { %1684 = vmatprep.subr.bf16.mxu0 %v1913_v23 }
 0x4e5   : > { %v1665_v10 = vpack.c.bf16 %v729_v32, %v728_v34 }
 0x4e6   : > { %v1809_v9 = vpop.eup %1808  ;;  %v366_v42 = vpop.permute.xlu1 %365 }
 0x4e7   : > { %1667 = vmatpush3.bf16.xpose.msk.msra.mxu1 %vm2232_vm4, %v1665_v10  ;;  %v1076_v36 = vmul.f32 %v1809_v9, %v2192_v19  ;;  %v479_v19 = vadd.f32 %v2068_v13, %v366_v42 }
 0x4e8   : > { %1668 = vmatprep.subr.bf16.mxu1 %v1913_v23  ;;  %v361_v23 = vpop.permute.xlu0 %360 }
 0x4e9   : > { %v1811_v35 = vpop.eup %1810 }
 0x4ea   : > { %v1077_v17 = vmul.f32 %v1811_v35, %v2200_v24  ;;  %v1813_v38 = vpop.eup %1812  ;;  %v474_v24 = vadd.f32 %v2070_v14, %v361_v23 }
 0x4eb   : > { %v730_v40 = vmul.f32 %v1813_v38, %v2196_v21  ;;  %v1177_v21 = vld [vmem:[%s2397_s3] sm:$0xff] }
 0x4ec   : > { %v1685_v16 = vpack.c.bf16 %v1077_v17, %v1076_v36 }
 0x4ed   : > { %v1815_v39 = vpop.eup %1814 }
 0x4ee   : > { %v731_v41 = vmul.f32 %v1815_v39, %v2206_v28  ;;  %1687 = vmatpush3.bf16.xpose.msk.msra.mxu0 %vm2232_vm4, %v1685_v16 }
 0x4f0   : > { %v1669_v45 = vpack.c.bf16 %v731_v41, %v730_v40 }
 0x4f2   : > { %1671 = vmatpush3.bf16.xpose.msk.msra.mxu1 %vm2232_vm4, %v1669_v45 }
 0x4f5   : > { %1636 = vmatmul.mubr.msk.f32.vlgmr.msra.gmra.mrb[14].mxu0 %vm265_vm0, %v479_v19 }
 0x4f9   : > { %1603 = vmatmul.mubr.msk.f32.vlgmr.msra.gmra.mrb[8].mxu1 %vm265_vm0, %v474_v24 }
 0x4fa   : > { %1642 = vmatprep.mubr.msk.f32.mxu1 %vm1205_vm5, %v1177_v21 }
 0x5c8   : > { %v1171_v28 = vpop.f32.mrb[14].mxu0 }
 0x5c9   : > { %1176 = vst.msk [vmem:[%s255_s20 + $0x8] sm:$0xff] %vm265_vm0, %v1171_v28  ;;  %v1637_v13 = vpop.f32.mrb[15].mxu0 }
 0x5cc   : > { %v825_v14 = vpop.f32.mrb[8].mxu1 }
 0x5cd   : > { %1175 = vst.msk [vmem:[%s255_s20] sm:$0xff] %vm265_vm0, %v825_v14  ;;  %v1688_v43 = vpack.c.bf16 %v1171_v28, %v825_v14  ;;  %v1604_v49 = vpop.f32.mrb[9].mxu1  ;;  %s1822_s20 = scalar_lea.vmem %s1821_s28, 512 }
 0x5ce   : > { %p1824_p1 = scmp.lt.s32.totalorder %s1822_s20, %s1816_s19 }
 0x5cf   : > { %1689 = vmatprep.subr.bf16.mxu1 %v1688_v43 }
 0x5d0   : > { %1691 = vmatpush3.bf16.msra.mxu1 %v1688_v43  ;;  %p1825_p2 = por %p1824_p1, %p1823_p0 }
 0x5d2   : > { %p1826_p3 = pnand %p1825_p2, %p1819_p13 }
 0x5d3   : > { %1643 = vmatmul.mubr.msk.f32.vlgmr.msra.gmra.mrb[10].mxu1 %vm1205_vm5, %v1178_v51 }
 0x5d4   : > { %1645 = vmatprep.mubr.msk.f32.mxu1 %vm1205_vm5, %v1179_v52 }
 0x5d7   : > { %1646 = vmatmul.mubr.msk.f32.gmra.mrb[12].mxu1 %vm1205_vm5, %v1180_v50 }
 0x5d8   : > { %1829 = shalt.err (!%p1826_p3)
}
 0x5d9   : > { %s1830_s29 = scalar_lea.hbm %s2304_s16, 256  ;;  %s1834_s11 = scalar_lea.hbm %s2400_s6, 512 }
 0x5da   : > { %p1831_p4 = scmp.ne.s32.totalorder %s2304_s16, %s1830_s29  ;;  %p1835_p9 = scmp.lt.u32.totalorder %s2304_s16, %s2400_s6 }
 0x5db   : > { %p1836_p10 = scmp.lt.u32.totalorder %s1834_s11, %s1830_s29  ;;  %p1838_p12 = scmp.lt.u32.totalorder %s1830_s29, %s2304_s16 }
 0x5dc   : > { %p1832_p7 = pnand %p1831_p4, %p1993_p5 }
 0x5dd   : > { %p1837_p11 = por %p1836_p10, %p1835_p9 }
 0x5de   : > { %p1833_p8 = pneg %p1832_p7 }
 0x5df   : > { %p1839_p13 = por %p1838_p12, %p1837_p11 }
 0x5e1   : > { %p1840_p0 = pnand %p1839_p13, %p1833_p8 }
 0x5e3   : > { %1843 = shalt.err (!%p1840_p0)
}
 0x5e4   : > { %s1917_s15 = smov 128   ;;  %s1918_s19 = smov 8   ;;  %v1193_v53 = vpop.permute.xlu0 %1192  ;;  %v1188_v58 = vpop.permute.xlu1 %1187 }
 0x5e5   : > { %1693 = dma.vmem_to_hbm [thread:$0]  (%p1993_p5), %s2298_s12, 256, %s2304_s16, %s1317_s17, %s1917_s15, %s1917_s15, %s1918_s19  }
 0x5e6   : > { %s1444_s26 = sshll.u32 %s2281_s18, 5  ;;  %s1501_s12 = sshll.u32 %s1976_s25, 9 }
 0x5e7   : > { %s248_s28 = scalar_lea.vmem [#allocation2], %s1444_s26  ;;  %s2346_s29 = scalar_lea.hbm %s2399_s5, %s1501_s12 }
 0x5e8   : > { %v1203_v3 = vpop.permute.xlu0 %1202  ;;  %v1198_v4 = vpop.permute.xlu1 %1197  ;;  %s1330_s20 = sshll.u32 %s248_s28, 4  ;;  %s1312_s25 = scalar_lea.sflag [#allocation3], %s2281_s18  ;;  %s2340_s20 = int_to_ptr.vmem [resolvable:$true] %s1330_s20 }
 0x5e9   : > { %s1844_s9 = scalar_lea.vmem %s2340_s20, 512  ;;  %s1919_s10 = smov [#allocation2]  }
 0x5ea   : > { %p1845_p1 = scmp.ne.s32.totalorder %s2340_s20, %s1844_s9  ;;  %s1848_s11 = sshll.u32 %s1919_s10, 4  ;;  %s1849_s11 = int_to_ptr.vmem [resolvable:$false] %s1848_s11 }
 0x5eb   : > { %s1850_s13 = scalar_lea.vmem %s1849_s11, 1024  ;;  %p1851_p4 = scmp.lt.s32.totalorder %s2340_s20, %s1849_s11 }
 0x5ec   : > { %p1846_p2 = pnand %p1845_p1, %p1993_p5  ;;  %p1852_p7 = scmp.lt.s32.totalorder %s1850_s13, %s1844_s9 }
 0x5ee   : > { %p1847_p3 = pneg %p1846_p2  ;;  %p1853_p8 = por %p1852_p7, %p1851_p4 }
 0x5f0   : > { %p1854_p9 = pnand %p1853_p8, %p1847_p3 }
 0x6a6   : > { %v1644_v46 = vpop.f32.mrb[10].mxu1 }
 0x6a7   : > { %v1290_v60 = vadd.f32 %v1644_v46, %v1193_v53  ;;  %v1284_v61 = vpop.f32.mrb[11].mxu1 }
 0x6a8   : > { %v1285_v62 = vadd.f32 %v1284_v61, %v1188_v58 }
 0x6a9   : > { %v1304_v63 = vadd.f32 %v1290_v60, %v2012_v2 }
 0x6aa   : > { %v1303_v22 = vadd.f32 %v1285_v62, %v2008_v0  ;;  %v1647_v29 = vpop.f32.mrb[12].mxu1 }
 0x6ab   : > { %1308 = vst.msk [vmem:[%s248_s28 + $0x8] sm:$0xff] %vm265_vm0, %v1304_v63  ;;  %v1300_v48 = vadd.f32 %v1647_v29, %v1203_v3  ;;  %v1294_v7 = vpop.f32.mrb[13].mxu1 }
 0x6ac   : > { %1307 = vst.msk [vmem:[%s248_s28] sm:$0xff] %vm265_vm0, %v1303_v22  ;;  %v1295_v8 = vadd.f32 %v1294_v7, %v1198_v4 }
 0x6ad   : > { %v1306_v26 = vadd.f32 %v1300_v48, %v2018_v5 }
 0x6ae   : > { %v1305_v0 = vadd.f32 %v1295_v8, %v2010_v1 }
 0x6af   : > { %1310 = vst.msk [vmem:[%s248_s28 + $0x18] sm:$0xff] %vm265_vm0, %v1306_v26 }
 0x6b0   : > { %1309 = vst.msk [vmem:[%s248_s28 + $0x10] sm:$0xff] %vm265_vm0, %v1305_v0 }
 0x6b1   : > { %1857 = shalt.err (!%p1854_p9)
}
 0x6b2   : > { %s1858_s14 = scalar_lea.hbm %s2346_s29, 512  ;;  %s1862_s12 = scalar_lea.hbm %s2399_s5, 1024 }
 0x6b3   : > { %p1859_p10 = scmp.ne.s32.totalorder %s2346_s29, %s1858_s14  ;;  %p1863_p13 = scmp.lt.u32.totalorder %s2346_s29, %s2399_s5 }
 0x6b4   : > { %p1864_p0 = scmp.lt.u32.totalorder %s1862_s12, %s1858_s14  ;;  %p1866_p2 = scmp.lt.u32.totalorder %s1858_s14, %s2346_s29 }
 0x6b5   : > { %p1860_p11 = pnand %p1859_p10, %p1993_p5 }
 0x6b6   : > { %p1865_p1 = por %p1864_p0, %p1863_p13 }
 0x6b7   : > { %p1861_p12 = pneg %p1860_p11 }
 0x6b8   : > { %p1867_p3 = por %p1866_p2, %p1865_p1 }
 0x6ba   : > { %p1868_p4 = pnand %p1867_p3, %p1861_p12 }
 0x6bc   : > { %1871 = shalt.err (!%p1868_p4)
}
 0x6bd   : > { %1692 = dma.vmem_to_hbm [thread:$0]  (%p1993_p5), %s2340_s20, 512, %s2346_s29, %s1312_s25, %s1917_s15, %s1917_s15, %s1918_s19  }
 0x6be PF: > { %p1703_p7 = scmp.ge.s32.totalorder %s1910_s24, 2  ;;  %s1361_s9 = sand.u32 1, %s1898_s21  }
 0x6bf   : > { %s1362_s10 = scalar_lea.sflag [#allocation3], %s1361_s9 }
 0x6c0   : > { %p1697_p8 = pnand %p1703_p7, %p1997_p6 }
 0x6c2   : > { %1889 = dma.done.wait (!%p1697_p8), %s1362_s10, 512  }
 0x6c3   : > { %1891 = vsyncadd (!%p1697_p8), %s1362_s10, 4294966784  ;;  %s1371_s7 = scalar_lea.sflag [#allocation5], %s1361_s9 }
 0x6c4   : > { %1893 = dma.done.wait (!%p1697_p8), %s1371_s7, 256  }
 0x6c5   : > { %1895 = vsyncadd (!%p1697_p8), %s1371_s7, 4294967040  ;;  %p20_p5 = scmp.ge.s32.totalorder %s1980_s27, 4   ;;  %s2405_s21 = smov %s1902_s22 }
 0x6c6   : > { %s2406_s22 = smov %s1906_s23  ;;  %s2407_s23 = smov %s1991_s30 }
 0x6c7   : > { %s2408_s24 = smov %s1980_s27  ;;  %22 = sbr.rel (!%p20_p5) target bundleno = 5 (0x5), region = 92 }
 0x6ce   :  { %1376 = vsyncpa [#allocation3], 1 }
 0x6cf   :  { %1378 = vsyncpa [#allocation3 + $0x1], 1 }
 0x6d0   :  { %1379 = vsyncpa [#allocation5], 1 }
 0x6d1   :  { %1381 = vsyncpa [#allocation5 + $0x1], 1 }

</bundles_post_ra>
